<compile_context>
chip_gen: v6e
topology: v6e:2x2x1
jax: 0.10.0
libtpu: 0.0.40
codegen_flags: <defaults>
</compile_context>

<pallas_src>
import math
import functools

import jax
import jax.numpy as jnp
from jax.experimental import pallas as pl
from jax.experimental.pallas import tpu as pltpu


# ----------------------------- tiling helpers ------------------------------

def _pick_m_block(m, target):
    """Row-tile size: <= target, multiple of 8 (or == m). Prefers exact divisors."""
    if m <= target:
        return m
    d = (target // 8) * 8
    while d >= 8:
        if m % d == 0:
            return d
        d -= 8
    # Ragged last block: out-of-bounds output rows are masked on store.
    return (target // 8) * 8


def _pick_kn_block(dim, target, align=128):
    """K/N tile size: exact divisor, multiple of `align`, else the full dim."""
    if dim <= target:
        return dim
    d = (target // align) * align
    while d >= align:
        if dim % d == 0:
            return d
        d -= align
    return dim  # fall back to an untiled (full) dimension — always correct


# ------------------- fused matmul + BN affine (+res, +ReLU) ----------------

def _matmul_affine_kernel(*refs, relu, has_identity):
    if has_identity:
        a_ref, b_ref, s_ref, c_ref, id_ref, o_ref, acc_ref = refs
    else:
        a_ref, b_ref, s_ref, c_ref, o_ref, acc_ref = refs
        id_ref = None

    kx = pl.program_id(2)

    @pl.when(kx == 0)
    def _():
        acc_ref[...] = jnp.zeros_like(acc_ref)

    a = a_ref[...].astype(jnp.bfloat16)          # bf16 MXU inputs
    b = b_ref[...].astype(jnp.bfloat16)
    acc_ref[...] += jnp.dot(a, b, preferred_element_type=jnp.float32)

    @pl.when(kx == pl.num_programs(2) - 1)
    def _():
        out = acc_ref[...] * s_ref[...] + c_ref[...]     # f32 epilogue
        if has_identity:
            out = out + id_ref[...].astype(jnp.float32)  # fused residual
        if relu:
            out = jnp.maximum(out, 0.0)
        o_ref[...] = out.astype(o_ref.dtype)


def matmul_affine(a, b, scale, bias, identity=None, *, relu=False,
                  out_dtype=jnp.float32, tm=256, tn=512, tk=512):
    """out[m,n] = act((sum_k a[m,k] b[k,n]) * scale[n] + bias[n] [+ identity[m,n]])."""
    M, K = a.shape
    K2, N = b.shape
    assert K == K2
    bm = _pick_m_block(M, tm)
    bn = _pick_kn_block(N, tn)
    bk = _pick_kn_block(K, tk)
    grid = (pl.cdiv(M, bm), pl.cdiv(N, bn), pl.cdiv(K, bk))

    in_specs = [
        pl.BlockSpec((bm, bk), lambda i, j, k: (i, k)),
        pl.BlockSpec((bk, bn), lambda i, j, k: (k, j)),
        pl.BlockSpec((1, bn), lambda i, j, k: (0, j)),
        pl.BlockSpec((1, bn), lambda i, j, k: (0, j)),
    ]
    args = [a, b,
            scale.reshape(1, N).astype(jnp.float32),
            bias.reshape(1, N).astype(jnp.float32)]
    if identity is not None:
        in_specs.append(pl.BlockSpec((bm, bn), lambda i, j, k: (i, j)))
        args.append(identity)

    return pl.pallas_call(
        functools.partial(_matmul_affine_kernel, relu=relu,
                          has_identity=identity is not None),
        out_shape=jax.ShapeDtypeStruct((M, N), out_dtype),
        grid=grid,
        in_specs=in_specs,
        out_specs=pl.BlockSpec((bm, bn), lambda i, j, k: (i, j)),
        scratch_shapes=[pltpu.VMEM((bm, bn), jnp.float32)],
        compiler_params=pltpu.CompilerParams(
            dimension_semantics=("parallel", "parallel", "arbitrary"),
            vmem_limit_bytes=32 * 1024 * 1024),
    )(*args)


# ------------------------------- average pool ------------------------------

def _avgpool_kernel(x_ref, o_ref, *, inv_kk):
    # x_ref: (kk, bm, C) — reduce over the leading (non-lane) axis.
    acc = jnp.sum(x_ref[...].astype(jnp.float32), axis=0)
    o_ref[...] = (acc * inv_kk).astype(o_ref.dtype)


def avgpool2d(x, k):
    """NHWC average pool with kernel=stride=k (exact cover)."""
    B, H, W, C = x.shape
    assert H % k == 0 and W % k == 0
    Ho, Wo = H // k, W // k
    kk = k * k
    M = B * Ho * Wo
    patches = (x.reshape(B, Ho, k, Wo, k, C)
                .transpose(2, 4, 0, 1, 3, 5)
                .reshape(kk, M, C))
    bm = M if M <= 512 else 512
    out = pl.pallas_call(
        functools.partial(_avgpool_kernel, inv_kk=1.0 / float(kk)),
        out_shape=jax.ShapeDtypeStruct((M, C), x.dtype),
        grid=(pl.cdiv(M, bm),),
        in_specs=[pl.BlockSpec((kk, bm, C), lambda i: (0, i, 0))],
        out_specs=pl.BlockSpec((bm, C), lambda i: (i, 0)),
        compiler_params=pltpu.CompilerParams(
            dimension_semantics=("parallel",)),
    )(patches)
    return out.reshape(B, Ho, Wo, C)


# --------------------------------- attention --------------------------------

def _attention_kernel(q_ref, k_ref, v_ref, o_ref):
    q = q_ref[...]                                   # (hb, L, hd)
    k = k_ref[...]
    v = v_ref[...]
    s = jnp.einsum("hqd,hkd->hqk", q, k, preferred_element_type=jnp.float32)
    m = jnp.max(s, axis=-1, keepdims=True)
    p = jnp.exp(s - m)
    denom = jnp.sum(p, axis=-1, keepdims=True)
    p = p * pl.reciprocal(denom, approx=True)
    o = jnp.einsum("hqk,hkd->hqd", p, v, preferred_element_type=jnp.float32)
    o_ref[...] = o.astype(o_ref.dtype)


def attention(q, k, v, *, max_heads_per_step=8):
    """q,k,v: (B*heads, L, head_dim) -> softmax(q k^T) v, several heads per step."""
    BH, L, HD = q.shape
    hb = min(max_heads_per_step, BH)
    while BH % hb != 0:
        hb -= 1
    spec = pl.BlockSpec((hb, L, HD), lambda i: (i, 0, 0))
    return pl.pallas_call(
        _attention_kernel,
        out_shape=jax.ShapeDtypeStruct((BH, L, HD), jnp.float32),
        grid=(BH // hb,),
        in_specs=[spec, spec, spec],
        out_specs=spec,
        compiler_params=pltpu.CompilerParams(
            dimension_semantics=("parallel",)),
    )(q, k, v)


# ----------------------------- conv via im2col -----------------------------

def _im2col(x, w, stride):
    B, H, W, Cin = x.shape
    Cout, Cin2, kh, kw = w.shape
    assert Cin == Cin2
    pad = (kh - 1) // 2
    Ho = (H + 2 * pad - kh) // stride + 1
    Wo = (W + 2 * pad - kw) // stride + 1
    if kh == 1 and kw == 1 and stride == 1:
        patches = x.reshape(B * H * W, Cin)
        wmat = w.reshape(Cout, Cin).T
    else:
        # TODO(synk): fuse 3x3 patch extraction into the matmul kernel
        # (Element-indexed halo blocks) to avoid the k*k-expanded HBM patch
        # tensor; kept in JAX (bf16) for lowering safety.
        xp = jnp.pad(x, ((0, 0), (pad, pad), (pad, pad), (0, 0)))
        cols = []
        for ki in range(kh):
            for kj in range(kw):
                sl = xp[:, ki::stride, kj::stride, :][:, :Ho, :Wo, :]
                cols.append(sl)
        patches = jnp.stack(cols, axis=3).reshape(B * Ho * Wo, kh * kw * Cin)
        wmat = jnp.transpose(w, (2, 3, 1, 0)).reshape(kh * kw * Cin, Cout)
    return patches.astype(jnp.bfloat16), wmat.astype(jnp.bfloat16), (B, Ho, Wo, Cout)


def conv_bn(x, w, scale, bias, *, stride=1, relu=True, identity=None,
            out_dtype=jnp.bfloat16):
    patches, wmat, oshape = _im2col(x, w, stride)
    id2 = None
    if identity is not None:
        id2 = identity.reshape(patches.shape[0], oshape[-1])
    out = matmul_affine(patches, wmat, scale, bias, identity=id2,
                        relu=relu, out_dtype=out_dtype)
    return out.reshape(oshape)


# ------------------------------ model forward ------------------------------

def bottleneck_forward(x, p):
    out = conv_bn(x, p["w1"], p["s1"], p["b1"], relu=True)          # 1x1
    out = conv_bn(out, p["w2"], p["s2"], p["b2"], relu=True)        # 3x3 pad=1
    if p["stride"] > 1:
        out = avgpool2d(out, p["stride"])
        identity = avgpool2d(x, p["stride"])
    else:
        identity = x
    if "wd" in p:
        identity = conv_bn(identity, p["wd"], p["sd"], p["bd"], relu=False)
    # 1x1 conv -> BN -> (+identity) -> ReLU, all fused in one kernel epilogue.
    return conv_bn(out, p["w3"], p["s3"], p["b3"], relu=True, identity=identity)


def attnpool_forward(x, p, num_heads):
    B, H, W, C = x.shape
    E = C
    xs = x.reshape(B, H * W, C).transpose(1, 0, 2).astype(jnp.float32)  # (HW, B, E)
    mean_tok = jnp.mean(xs, axis=0, keepdims=True)                      # (1, B, E)
    xs = jnp.concatenate([mean_tok, xs], axis=0)                        # (L, B, E)
    xs = xs + p["pos"][:, None, :]
    L = xs.shape[0]
    hd = E // num_heads
    scaling = float(hd) ** -0.5

    x2 = xs.reshape(L * B, E)

    # Fused q/k/v projection (one (E, 3E) matmul). torch MHA scales q
    # (including its bias) by 1/sqrt(head_dim) after projection.
    w_qkv = jnp.concatenate([p["qw"].T, p["kw"].T, p["vw"].T], axis=1)  # (E, 3E)
    s_qkv = jnp.concatenate([jnp.full((E,), scaling, jnp.float32),
                             jnp.ones((E,), jnp.float32),
                             jnp.ones((E,), jnp.float32)])
    b_qkv = jnp.concatenate([p["qb"] * scaling, p["kb"], p["vb"]])
    qkv = matmul_affine(x2, w_qkv, s_qkv, b_qkv, out_dtype=jnp.float32)
    q, k, v = qkv[:, :E], qkv[:, E:2 * E], qkv[:, 2 * E:]

    def split_heads(t):
        return (t.reshape(L, B, num_heads, hd)
                 .transpose(1, 2, 0, 3)
                 .reshape(B * num_heads, L, hd))

    o = attention(split_heads(q), split_heads(k), split_heads(v))
    o = (o.reshape(B, num_heads, L, hd)
          .transpose(2, 0, 1, 3)
          .reshape(L * B, E))
    out_dim = p["cw"].shape[0]
    o = matmul_affine(o, p["cw"].T, jnp.ones((out_dim,), jnp.float32),
                      p["cb"], out_dtype=jnp.float32)
    o = o.reshape(L, B, out_dim)
    return o[0]                                                     # (B, output_dim)


def modified_resnet_forward(params, x_nchw, num_heads):
    x = jnp.transpose(x_nchw, (0, 2, 3, 1)).astype(jnp.bfloat16)    # NCHW -> NHWC bf16
    # stem
    x = conv_bn(x, params["c1w"], params["c1s"], params["c1b"], stride=2, relu=True)
    x = conv_bn(x, params["c2w"], params["c2s"], params["c2b"], relu=True)
    x = conv_bn(x, params["c3w"], params["c3s"], params["c3b"], relu=True)
    x = avgpool2d(x, 2)
    # residual stages
    for name in ("layer1", "layer2", "layer3", "layer4"):
        for blk in params[name]:
            x = bottleneck_forward(x, blk)
    return attnpool_forward(x, params["attn"], num_heads)


# --------------------------- parameter construction ------------------------

class KeyGen:
    def __init__(self, key):
        self.key = key
        self.i = 0

    def __call__(self):
        self.i += 1
        return jax.random.fold_in(self.key, self.i)


def conv_w(key, cout, cin, k):
    fan_in = cin * k * k
    return jax.random.normal(key, (cout, cin, k, k), jnp.float32) / math.sqrt(fan_in)


def bn_fold(key, c, eps=1e-5):
    k1, k2, k3 = jax.random.split(key, 3)
    gamma = 1.0 + 0.1 * jax.random.normal(k1, (c,), jnp.float32)
    beta = 0.1 * jax.random.normal(k2, (c,), jnp.float32)
    mean = 0.1 * jax.random.normal(k3, (c,), jnp.float32)
    var = jnp.ones((c,), jnp.float32)
    scale = gamma / jnp.sqrt(var + eps)
    bias = beta - mean * scale
    return scale, bias


def linear_w(key, out_f, in_f):
    k1, k2 = jax.random.split(key)
    w = jax.random.normal(k1, (out_f, in_f), jnp.float32) / math.sqrt(in_f)
    b = 0.01 * jax.random.normal(k2, (out_f,), jnp.float32)
    return w, b


def make_bottleneck(kg, inplanes, planes, stride):
    p = {"stride": stride}
    p["w1"] = conv_w(kg(), planes, inplanes, 1)
    p["s1"], p["b1"] = bn_fold(kg(), planes)
    p["w2"] = conv_w(kg(), planes, planes, 3)
    p["s2"], p["b2"] = bn_fold(kg(), planes)
    p["w3"] = conv_w(kg(), planes * 4, planes, 1)
    p["s3"], p["b3"] = bn_fold(kg(), planes * 4)
    if stride > 1 or inplanes != planes * 4:
        p["wd"] = conv_w(kg(), planes * 4, inplanes, 1)
        p["sd"], p["bd"] = bn_fold(kg(), planes * 4)
    return p


def init_params(key, layers, output_dim, heads, input_resolution, width):
    kg = KeyGen(key)
    P = {}
    P["c1w"] = conv_w(kg(), width // 2, 3, 3)
    P["c1s"], P["c1b"] = bn_fold(kg(), width // 2)
    P["c2w"] = conv_w(kg(), width // 2, width // 2, 3)
    P["c2s"], P["c2b"] = bn_fold(kg(), width // 2)
    P["c3w"] = conv_w(kg(), width, width // 2, 3)
    P["c3s"], P["c3b"] = bn_fold(kg(), width)

    inplanes = width

    def make_layer(planes, blocks, stride):
        nonlocal inplanes
        blks = [make_bottleneck(kg, inplanes, planes, stride)]
        inplanes = planes * 4
        for _ in range(1, blocks):
            blks.append(make_bottleneck(kg, inplanes, planes, 1))
        return blks

    P["layer1"] = make_layer(width, layers[0], 1)
    P["layer2"] = make_layer(width * 2, layers[1], 2)
    P["layer3"] = make_layer(width * 4, layers[2], 2)
    P["layer4"] = make_layer(width * 8, layers[3], 2)

    embed_dim = width * 32
    spacial = input_resolution // 32
    A = {}
    A["pos"] = jax.random.normal(kg(), (spacial * spacial + 1, embed_dim),
                                 jnp.float32) / math.sqrt(embed_dim)
    A["qw"], A["qb"] = linear_w(kg(), embed_dim, embed_dim)
    A["kw"], A["kb"] = linear_w(kg(), embed_dim, embed_dim)
    A["vw"], A["vb"] = linear_w(kg(), embed_dim, embed_dim)
    A["cw"], A["cb"] = linear_w(kg(), output_dim, embed_dim)
    P["attn"] = A
    return P


# ----------------------------------- main -----------------------------------

if __name__ == "__main__":
    key = jax.random.PRNGKey(0)
    layers = (1, 1, 1, 1)
    width = 8                 # embed_dim = width*32 = 256
    heads = 4                 # head_dim = 64
    output_dim = 32
    input_resolution = 32     # spacial_dim = 1 after /32 downsampling
    batch = 2

    params = init_params(key, layers, output_dim, heads, input_resolution, width)
    x = jax.random.normal(jax.random.fold_in(key, 12345),
                          (batch, 3, input_resolution, input_resolution),
                          jnp.float32)

    out = modified_resnet_forward(params, x, heads)
    out = jax.block_until_ready(out)
    assert out.shape == (batch, output_dim), out.shape
    assert bool(jnp.all(jnp.isfinite(out)))
    print("KERNEL_OK")
</pallas_src>

<mosaic_0001>
module attributes {stable_mosaic.version = 11 : i64} {
  func.func @_matmul_affine_kernel(%arg0: i32, %arg1: i32, %arg2: i32, %arg3: memref<256x27xbf16, #tpu.memory_space<vmem>>, %arg4: memref<27x4xbf16, #tpu.memory_space<vmem>>, %arg5: memref<1x4xf32, #tpu.memory_space<vmem>>, %arg6: memref<1x4xf32, #tpu.memory_space<vmem>>, %arg7: memref<256x4xbf16, #tpu.memory_space<vmem>>, %arg8: memref<256x4xf32, #tpu.memory_space<vmem>>) attributes {dimension_semantics = [#tpu.dimension_semantics<parallel>, #tpu.dimension_semantics<parallel>, #tpu.dimension_semantics<arbitrary>], iteration_bounds = array<i64: 2, 1, 1>, scalar_prefetch = 0 : i64, scratch_operands = 1 : i64, tpu.core_type = #tpu.core_type<tc>, window_params = [{transform_indices = @transform_0, window_bounds = array<i64: 256, 27>}, {transform_indices = @transform_1, window_bounds = array<i64: 27, 4>}, {transform_indices = @transform_2, window_bounds = array<i64: 1, 4>}, {transform_indices = @transform_3, window_bounds = array<i64: 1, 4>}, {transform_indices = @transform_4, window_bounds = array<i64: 256, 4>}]} {
    %c0_i32 = arith.constant 0 : i32
    %0 = arith.cmpi eq, %arg2, %c0_i32 : i32
    %1 = arith.extui %0 : i1 to i32
    %c0_i32_0 = arith.constant 0 : i32
    %2 = arith.cmpi ne, %1, %c0_i32_0 : i32
    scf.if %2 {
      %cst_10 = arith.constant 0.000000e+00 : f32
      %12 = vector.broadcast %cst_10 : f32 to vector<256x4xf32>
      %c0_11 = arith.constant 0 : index
      %c0_12 = arith.constant 0 : index
      %13 = vector.load %arg8[%c0_11, %c0_12] : memref<256x4xf32, #tpu.memory_space<vmem>>, vector<256x4xf32>
      tpu.vector_store %arg8[%c0_11, %c0_12], %12 {strides = array<i32>} : memref<256x4xf32, #tpu.memory_space<vmem>>, vector<256x4xf32>,
    } else {
    }
    %c0 = arith.constant 0 : index
    %c0_1 = arith.constant 0 : index
    %3 = vector.load %arg3[%c0, %c0_1] : memref<256x27xbf16, #tpu.memory_space<vmem>>, vector<256x27xbf16>
    %c0_2 = arith.constant 0 : index
    %c0_3 = arith.constant 0 : index
    %4 = vector.load %arg4[%c0_2, %c0_3] : memref<27x4xbf16, #tpu.memory_space<vmem>>, vector<27x4xbf16>
    %c0_4 = arith.constant 0 : index
    %c0_5 = arith.constant 0 : index
    %5 = vector.load %arg8[%c0_4, %c0_5] : memref<256x4xf32, #tpu.memory_space<vmem>>, vector<256x4xf32>
    %cst = arith.constant dense<0.000000e+00> : vector<256x4xf32>
    %6 = tpu.matmul %3, %4, %cst {dimension_numbers = #tpu.dot_dimension_numbers<[1], [0], [0], [1], [0, 0, 1, 1], [], []>} : vector<256x27xbf16>, vector<27x4xbf16>, vector<256x4xf32> -> vector<256x4xf32>
    %7 = arith.addf %5, %6 : vector<256x4xf32>
    %c0_6 = arith.constant 0 : index
    %c0_7 = arith.constant 0 : index
    %8 = vector.load %arg8[%c0_6, %c0_7] : memref<256x4xf32, #tpu.memory_space<vmem>>, vector<256x4xf32>
    tpu.vector_store %arg8[%c0_6, %c0_7], %7 {strides = array<i32>} : memref<256x4xf32, #tpu.memory_space<vmem>>, vector<256x4xf32>,
    %c0_i32_8 = arith.constant 0 : i32
    %9 = arith.cmpi eq, %arg2, %c0_i32_8 : i32
    %10 = arith.extui %9 : i1 to i32
    %c0_i32_9 = arith.constant 0 : i32
    %11 = arith.cmpi ne, %10, %c0_i32_9 : i32
    scf.if %11 {
      %c0_10 = arith.constant 0 : index
      %c0_11 = arith.constant 0 : index
      %12 = vector.load %arg8[%c0_10, %c0_11] : memref<256x4xf32, #tpu.memory_space<vmem>>, vector<256x4xf32>
      %c0_12 = arith.constant 0 : index
      %c0_13 = arith.constant 0 : index
      %13 = vector.load %arg5[%c0_12, %c0_13] : memref<1x4xf32, #tpu.memory_space<vmem>>, vector<1x4xf32>
      %14 = vector.broadcast %13 : vector<1x4xf32> to vector<256x4xf32>
      %15 = arith.mulf %12, %14 : vector<256x4xf32>
      %c0_14 = arith.constant 0 : index
      %c0_15 = arith.constant 0 : index
      %16 = vector.load %arg6[%c0_14, %c0_15] : memref<1x4xf32, #tpu.memory_space<vmem>>, vector<1x4xf32>
      %17 = vector.broadcast %16 : vector<1x4xf32> to vector<256x4xf32>
      %18 = arith.addf %15, %17 : vector<256x4xf32>
      %cst_16 = arith.constant 0.000000e+00 : f32
      %19 = vector.broadcast %cst_16 : f32 to vector<256x4xf32>
      %20 = arith.maximumf %18, %19 : vector<256x4xf32>
      %21 = arith.truncf %20 : vector<256x4xf32> to vector<256x4xbf16>
      %c0_17 = arith.constant 0 : index
      %c0_18 = arith.constant 0 : index
      %22 = vector.load %arg7[%c0_17, %c0_18] : memref<256x4xbf16, #tpu.memory_space<vmem>>, vector<256x4xbf16>
      tpu.vector_store %arg7[%c0_17, %c0_18], %21 {strides = array<i32>} : memref<256x4xbf16, #tpu.memory_space<vmem>>, vector<256x4xbf16>,
    } else {
    }
    return
  }
  func.func @transform_0(%arg0: i32, %arg1: i32, %arg2: i32) -> (i32, i32) {
    %c0_i32 = arith.constant 0 : i32
    return %arg0, %arg2 : i32, i32
  }
  func.func @transform_1(%arg0: i32, %arg1: i32, %arg2: i32) -> (i32, i32) {
    %c0_i32 = arith.constant 0 : i32
    return %arg2, %arg1 : i32, i32
  }
  func.func @transform_2(%arg0: i32, %arg1: i32, %arg2: i32) -> (i32, i32) {
    %c0_i32 = arith.constant 0 : i32
    %c0_i32_0 = arith.constant 0 : i32
    return %c0_i32, %arg1 : i32, i32
  }
  func.func @transform_3(%arg0: i32, %arg1: i32, %arg2: i32) -> (i32, i32) {
    %c0_i32 = arith.constant 0 : i32
    %c0_i32_0 = arith.constant 0 : i32
    return %c0_i32, %arg1 : i32, i32
  }
  func.func @transform_4(%arg0: i32, %arg1: i32, %arg2: i32) -> (i32, i32) {
    %c0_i32 = arith.constant 0 : i32
    return %arg0, %arg1 : i32, i32
  }
}

</mosaic_0001>

<bundles_post_ra>
// kernel: tpu_custom_call.1
= control target key start
LH: loop header
LB: loop body
LE: loop exit
PB: predicated region body
PF: predicated region fallthrough
CT: control target
= control target key end

     0   :  { %s1475_s15 = smov 0   ;;  %s1477_s16 = smov 0   ;;  %s1796_s0 = inlined_call_operand.vmem [shape: bf16[512,27], index: 0, kind: input, shape index: {}]   ;;  %s1797_s1 = inlined_call_operand.vmem [shape: bf16[27,4], index: 1, kind: input, shape index: {}]   ;;  %s1798_s2 = inlined_call_operand.vmem [shape: f32[1,4], index: 2, kind: input, shape index: {}]   ;;  %s1799_s3 = inlined_call_operand.vmem [shape: f32[1,4], index: 3, kind: input, shape index: {}]   ;;  %s1800_s4 = inlined_call_operand.vmem [shape: bf16[512,4], index: 4, kind: output, shape index: {}]  }
   0x1   :  { %s1479_s17 = smov 0  }
   0x2 LB: > { %s33_s18 = sadd.s32 1, %s1442_s16  ;;  %p1215_p0 = scmp.ge.s32.totalorder %s1446_s17, 1  ;;  %s1446_s17 = sphi %s1479_s17, %s14_s17   ;;  %s1442_s16 = sphi %s1477_s16, %s1803_s16   ;;  %s1438_s15 = sphi %s1475_s15, %s1802_s15  }
   0x3   : > { %p35_p1 = scmp.ge.s32.totalorder %s33_s18, 2  ;;  %p221_p2 = scmp.lt.s32.totalorder %s1446_s17, 3 }
   0x5   : > { %s1805_s18 = smov (%p35_p1, %s33_s18), 0  ;;  %p222_p3 = pnand %p1215_p0, %p221_p2 }
   0x6   : > { %s1216_s21 = sshll.u32 (!%p222_p3), %s1438_s15, 5 }
   0x7   : > { %225 = sbr.rel (%p222_p3) target bundleno = 279 (0x117), region = 36  ;;  %p1501_p4 = scmp.lt.s32.totalorder (!%p222_p3), %s1216_s21, 63 }
   0xc   : > { %v1406_v0 = vld [vmem:[%s1797_s1 + $0x8] sm:$0x3f]   ;;  %vm546_vm0 = vcmask 1044480   ;;  %vm547_vm1 = vcmask 1045504   ;;  %v1448_v1 = vmov 65535   ;;  %vm305_vm2 = vcmask 31744  }
   0xd   : > { %v548_v2 = vsel %vm546_vm0, 4294967295, %v1448_v1  ;;  %v1407_v5 = vld [vmem:[%s1797_s1] sm:$0xff]   ;;  %v1449_v6 = vmov 0.0   ;;  %s1807_s21 = smov (!%p1501_p4, %s1216_s21), 63  ;;  %vm497_vm3 = vcmask 220160   ;;  %vm1052_vm4 = vcmask 27648  }
   0xe   : > { %v549_v3 = vsel %vm547_vm1, %v548_v2, 0  ;;  %308 = vst.msk [vmem:[#allocation2 + $0x10] sm:$0xff] %vm305_vm2, %v1449_v6  ;;  %306 = vst.msk [vmem:[#allocation2] sm:$0xff] %vm305_vm2, %v1449_v6  ;;  %s1217_s25 = sshll.u32 %s1807_s21, 2  ;;  %v1595_v49 = vld [vmem:[%s1798_s2] ss:$0 sm:$0xff] }
   0xf   : > { %v551_v4 = vand.u32 %v1406_v0, %v549_v3  ;;  %307 = vst.msk [vmem:[#allocation2 + $0x8] sm:$0xff] %vm305_vm2, %v1449_v6  ;;  %309 = vst.msk [vmem:[#allocation2 + $0x18] sm:$0xff] %vm305_vm2, %v1449_v6  ;;  %s1552_s28 = scalar_lea.vmem %s1796_s0, %s1217_s25  ;;  %v1602_v57 = vld [vmem:[%s1799_s3] ss:$0 sm:$0xff]  ;;  %s1621_s9 = scalar_lea.vmem %s1800_s4, %s1217_s25 }
  0x10   : > { %310 = vst.msk [vmem:[#allocation2 + $0x20] sm:$0xff] %vm305_vm2, %v1449_v6  ;;  %311 = vst.msk [vmem:[#allocation2 + $0x28] sm:$0xff] %vm305_vm2, %v1449_v6  ;;  %v1408_v7 = vld [vmem:[%s1552_s28] sm:$0xff]   ;;  %v1410_v9 = vld [vmem:[%s1552_s28 + $0x8] sm:$0xff]  }
  0x11   : > { %312 = vst.msk [vmem:[#allocation2 + $0x30] sm:$0xff] %vm305_vm2, %v1449_v6  ;;  %313 = vst.msk [vmem:[#allocation2 + $0x38] sm:$0xff] %vm305_vm2, %v1449_v6  ;;  %1340 = vmatprep.subr.bf16.mxu0 %v551_v4  ;;  %1376 = vmatprep.subr.bf16.mxu1 %v551_v4  ;;  %v1409_v8 = vld [vmem:[%s1552_s28 + $0x40] sm:$0xff]   ;;  %v1411_v10 = vld [vmem:[%s1552_s28 + $0x48] sm:$0xff]  }
  0x12   : > { %314 = vst.msk [vmem:[#allocation2 + $0x40] sm:$0xff] %vm305_vm2, %v1449_v6  ;;  %315 = vst.msk [vmem:[#allocation2 + $0x48] sm:$0xff] %vm305_vm2, %v1449_v6  ;;  %1341 = vmatpush3.bf16.msra.mxu0 %v551_v4  ;;  %1378 = vmatpush3.bf16.msra.mxu1 %v551_v4  ;;  %v1412_v11 = vld [vmem:[%s1552_s28 + $0x10] sm:$0xff]   ;;  %v1414_v13 = vld [vmem:[%s1552_s28 + $0x18] sm:$0xff]  }
  0x13   : > { %316 = vst.msk [vmem:[#allocation2 + $0x50] sm:$0xff] %vm305_vm2, %v1449_v6  ;;  %317 = vst.msk [vmem:[#allocation2 + $0x58] sm:$0xff] %vm305_vm2, %v1449_v6  ;;  %1342 = vmatprep.subr.bf16.mxu0 %v1407_v5  ;;  %1377 = vmatprep.subr.bf16.mxu1 %v1407_v5  ;;  %v1413_v12 = vld [vmem:[%s1552_s28 + $0x50] sm:$0xff]   ;;  %v1415_v14 = vld [vmem:[%s1552_s28 + $0x58] sm:$0xff]  }
  0x14   : > { %318 = vst.msk [vmem:[#allocation2 + $0x60] sm:$0xff] %vm305_vm2, %v1449_v6  ;;  %319 = vst.msk [vmem:[#allocation2 + $0x68] sm:$0xff] %vm305_vm2, %v1449_v6  ;;  %1344 = vmatprep.mubr.msk.bf16.mxu0 %vm497_vm3, %v1408_v7  ;;  %1360 = vmatprep.mubr.msk.bf16.mxu1 %vm497_vm3, %v1409_v8  ;;  %v1416_v15 = vld [vmem:[%s1552_s28 + $0x20] sm:$0xff]   ;;  %v1418_v17 = vld [vmem:[%s1552_s28 + $0x28] sm:$0xff]  }
  0x15   : > { %320 = vst.msk [vmem:[#allocation2 + $0x70] sm:$0xff] %vm305_vm2, %v1449_v6  ;;  %321 = vst.msk [vmem:[#allocation2 + $0x78] sm:$0xff] %vm305_vm2, %v1449_v6  ;;  %v1417_v16 = vld [vmem:[%s1552_s28 + $0x60] sm:$0xff]   ;;  %v1419_v18 = vld [vmem:[%s1552_s28 + $0x68] sm:$0xff]  }
  0x16   : > { %322 = vst.msk [vmem:[#allocation2 + $0x80] sm:$0xff] %vm305_vm2, %v1449_v6  ;;  %323 = vst.msk [vmem:[#allocation2 + $0x88] sm:$0xff] %vm305_vm2, %v1449_v6  ;;  %1343 = vmatpush3.bf16.msra.mxu0 %v1407_v5  ;;  %1379 = vmatpush3.bf16.msra.mxu1 %v1407_v5  ;;  %v1420_v19 = vld [vmem:[%s1552_s28 + $0x30] sm:$0xff]   ;;  %v1422_v21 = vld [vmem:[%s1552_s28 + $0x38] sm:$0xff]  }
  0x17   : > { %324 = vst.msk [vmem:[#allocation2 + $0x90] sm:$0xff] %vm305_vm2, %v1449_v6  ;;  %325 = vst.msk [vmem:[#allocation2 + $0x98] sm:$0xff] %vm305_vm2, %v1449_v6  ;;  %v1421_v20 = vld [vmem:[%s1552_s28 + $0x70] sm:$0xff]   ;;  %v1423_v22 = vld [vmem:[%s1552_s28 + $0x78] sm:$0xff]  }
  0x18   : > { %326 = vst.msk [vmem:[#allocation2 + $0xa0] sm:$0xff] %vm305_vm2, %v1449_v6  ;;  %327 = vst.msk [vmem:[#allocation2 + $0xa8] sm:$0xff] %vm305_vm2, %v1449_v6  ;;  %v376_v23 = vld [vmem:[#allocation2 + $0x10] sm:$0xff]  ;;  %v374_v27 = vld [vmem:[#allocation2] sm:$0xff] }
  0x19   : > { %328 = vst.msk [vmem:[#allocation2 + $0xb0] sm:$0xff] %vm305_vm2, %v1449_v6  ;;  %329 = vst.msk [vmem:[#allocation2 + $0xb8] sm:$0xff] %vm305_vm2, %v1449_v6  ;;  %1345 = vmatmul.mubr.msk.bf16.vlgmr.msra.gmra.mxu0 %vm497_vm3, %v1410_v9  ;;  %1361 = vmatmul.mubr.msk.bf16.vlgmr.msra.gmra.mxu1 %vm497_vm3, %v1411_v10  ;;  %v377_v33 = vld [vmem:[#allocation2 + $0x18] sm:$0xff]  ;;  %v375_v39 = vld [vmem:[#allocation2 + $0x8] sm:$0xff] }
  0x1a   : > { %330 = vst.msk [vmem:[#allocation2 + $0xc0] sm:$0xff] %vm305_vm2, %v1449_v6  ;;  %331 = vst.msk [vmem:[#allocation2 + $0xc8] sm:$0xff] %vm305_vm2, %v1449_v6  ;;  %1348 = vmatprep.mubr.msk.bf16.mxu0 %vm497_vm3, %v1412_v11  ;;  %1364 = vmatprep.mubr.msk.bf16.mxu1 %vm497_vm3, %v1413_v12  ;;  %v380_v45 = vld [vmem:[#allocation2 + $0x30] sm:$0xff]  ;;  %v378_v52 = vld [vmem:[#allocation2 + $0x20] sm:$0xff] }
  0x1b   : > { %332 = vst.msk [vmem:[#allocation2 + $0xd0] sm:$0xff] %vm305_vm2, %v1449_v6  ;;  %333 = vst.msk [vmem:[#allocation2 + $0xd8] sm:$0xff] %vm305_vm2, %v1449_v6  ;;  %v381_v1 = vld [vmem:[#allocation2 + $0x38] sm:$0xff]  ;;  %v379_v11 = vld [vmem:[#allocation2 + $0x28] sm:$0xff] }
  0x1c   : > { %334 = vst.msk [vmem:[#allocation2 + $0xe0] sm:$0xff] %vm305_vm2, %v1449_v6  ;;  %335 = vst.msk [vmem:[#allocation2 + $0xe8] sm:$0xff] %vm305_vm2, %v1449_v6 }
  0x1d   : > { %336 = vst.msk [vmem:[#allocation2 + $0xf0] sm:$0xff] %vm305_vm2, %v1449_v6  ;;  %337 = vst.msk [vmem:[#allocation2 + $0xf8] sm:$0xff] %vm305_vm2, %v1449_v6  ;;  %v390_v28 = vld [vmem:[#allocation2 + $0x80] sm:$0xff]  ;;  %v391_v40 = vld [vmem:[#allocation2 + $0x88] sm:$0xff] }
  0x1e   : > { %v392_v24 = vld [vmem:[#allocation2 + $0x90] sm:$0xff]  ;;  %v393_v34 = vld [vmem:[#allocation2 + $0x98] sm:$0xff] }
  0x1f   : > { %v394_v53 = vld [vmem:[#allocation2 + $0xa0] sm:$0xff]  ;;  %v395_v12 = vld [vmem:[#allocation2 + $0xa8] sm:$0xff] }
  0x20   : > { %v396_v46 = vld [vmem:[#allocation2 + $0xb0] sm:$0xff]  ;;  %v397_v2 = vld [vmem:[#allocation2 + $0xb8] sm:$0xff] }
  0x21   : > { %1349 = vmatmul.mubr.msk.bf16.gmra.mxu0 %vm497_vm3, %v1414_v13  ;;  %1365 = vmatmul.mubr.msk.bf16.gmra.mxu1 %vm497_vm3, %v1415_v14 }
  0x22   : > { %1352 = vmatprep.mubr.msk.bf16.mxu0 %vm497_vm3, %v1416_v15  ;;  %1368 = vmatprep.mubr.msk.bf16.mxu1 %vm497_vm3, %v1417_v16 }
  0x29   : > { %1353 = vmatmul.mubr.msk.bf16.gmra.mxu0 %vm497_vm3, %v1418_v17  ;;  %1369 = vmatmul.mubr.msk.bf16.gmra.mxu1 %vm497_vm3, %v1419_v18 }
  0x2a   : > { %1356 = vmatprep.mubr.msk.bf16.mxu0 %vm497_vm3, %v1420_v19  ;;  %1372 = vmatprep.mubr.msk.bf16.mxu1 %vm497_vm3, %v1421_v20 }
  0x31   : > { %1357 = vmatmul.mubr.msk.bf16.gmra.mxu0 %vm497_vm3, %v1422_v21  ;;  %1373 = vmatmul.mubr.msk.bf16.gmra.mxu1 %vm497_vm3, %v1423_v22 }
  0xd9   : > { %v1346_v25 = vpop.f32.mrf.mxu0  ;;  %v1362_v26 = vpop.f32.mrf.mxu1 }
  0xda   : > { %v716_v29 = vadd.f32 %v1346_v25, %v376_v23  ;;  %v732_v30 = vadd.f32 %v1362_v26, %v392_v24 }
  0xdb   : > { %v587_v31 = vpop.f32.mrf.mxu0  ;;  %v651_v32 = vpop.f32.mrf.mxu1 }
  0xdc   : > { %749 = vst.msk [vmem:[#allocation2 + $0x10] sm:$0xff] %vm305_vm2, %v716_v29  ;;  %765 = vst.msk [vmem:[#allocation2 + $0x90] sm:$0xff] %vm305_vm2, %v732_v30  ;;  %v714_v35 = vadd.f32 %v587_v31, %v374_v27  ;;  %v730_v36 = vadd.f32 %v651_v32, %v390_v28 }
  0xdd   : > { %v1347_v37 = vpop.f32.mrf.mxu0  ;;  %v1363_v38 = vpop.f32.mrf.mxu1 }
  0xde   : > { %747 = vst.msk [vmem:[#allocation2] sm:$0xff] %vm305_vm2, %v714_v35  ;;  %763 = vst.msk [vmem:[#allocation2 + $0x80] sm:$0xff] %vm305_vm2, %v730_v36  ;;  %v717_v41 = vadd.f32 %v1347_v37, %v377_v33  ;;  %v733_v42 = vadd.f32 %v1363_v38, %v393_v34 }
  0xdf   : > { %v590_v43 = vpop.f32.mrf.mxu0  ;;  %v654_v44 = vpop.f32.mrf.mxu1 }
  0xe0   : > { %750 = vst.msk [vmem:[#allocation2 + $0x18] sm:$0xff] %vm305_vm2, %v717_v41  ;;  %766 = vst.msk [vmem:[#allocation2 + $0x98] sm:$0xff] %vm305_vm2, %v733_v42  ;;  %v715_v47 = vadd.f32 %v590_v43, %v375_v39  ;;  %v731_v48 = vadd.f32 %v654_v44, %v391_v40 }
  0xe1   : > { %v1350_v50 = vpop.f32.mrf.mxu0  ;;  %v1366_v51 = vpop.f32.mrf.mxu1 }
  0xe2   : > { %748 = vst.msk [vmem:[#allocation2 + $0x8] sm:$0xff] %vm305_vm2, %v715_v47  ;;  %764 = vst.msk [vmem:[#allocation2 + $0x88] sm:$0xff] %vm305_vm2, %v731_v48  ;;  %v720_v54 = vadd.f32 %v1350_v50, %v380_v45  ;;  %v736_v55 = vadd.f32 %v1366_v51, %v396_v46 }
  0xe3   : > { %v784_v56 = vld [vmem:[#allocation2 + $0x10] sm:$0xff]  ;;  %v603_v59 = vpop.f32.mrf.mxu0  ;;  %v667_v60 = vpop.f32.mrf.mxu1 }
  0xe4   : > { %v800_v58 = vld [vmem:[#allocation2 + $0x90] sm:$0xff]  ;;  %v823_v61 = vmul.f32 %v1595_v49, %v784_v56  ;;  %753 = vst.msk [vmem:[#allocation2 + $0x30] sm:$0xff] %vm305_vm2, %v720_v54  ;;  %769 = vst.msk [vmem:[#allocation2 + $0xb0] sm:$0xff] %vm305_vm2, %v736_v55  ;;  %v718_v63 = vadd.f32 %v603_v59, %v378_v52  ;;  %v734_v0 = vadd.f32 %v667_v60, %v394_v53 }
  0xe5   : > { %v839_v62 = vmul.f32 %v1595_v49, %v800_v58  ;;  %v782_v3 = vld [vmem:[#allocation2] sm:$0xff]  ;;  %v1351_v5 = vpop.f32.mrf.mxu0  ;;  %v1367_v6 = vpop.f32.mrf.mxu1 }
  0xe6   : > { %v798_v4 = vld [vmem:[#allocation2 + $0x80] sm:$0xff]  ;;  %v862_v7 = vadd.f32 %v1602_v57, %v823_v61  ;;  %v821_v9 = vmul.f32 %v1595_v49, %v782_v3  ;;  %751 = vst.msk [vmem:[#allocation2 + $0x20] sm:$0xff] %vm305_vm2, %v718_v63  ;;  %767 = vst.msk [vmem:[#allocation2 + $0xa0] sm:$0xff] %vm305_vm2, %v734_v0  ;;  %v721_v15 = vadd.f32 %v1351_v5, %v381_v1 }
  0xe7   : > { %v878_v8 = vadd.f32 %v1602_v57, %v839_v62  ;;  %v837_v10 = vmul.f32 %v1595_v49, %v798_v4  ;;  %v785_v13 = vld [vmem:[#allocation2 + $0x18] sm:$0xff]  ;;  %v737_v16 = vadd.f32 %v1367_v6, %v397_v2  ;;  %v606_v17 = vpop.f32.mrf.mxu0  ;;  %v670_v18 = vpop.f32.mrf.mxu1 }
  0xe8   : > { %v801_v14 = vld [vmem:[#allocation2 + $0x98] sm:$0xff]  ;;  %v894_v19 = vmax.f32 %v862_v7, 0.0  ;;  %v860_v21 = vadd.f32 %v1602_v57, %v821_v9  ;;  %v824_v23 = vmul.f32 %v1595_v49, %v785_v13  ;;  %754 = vst.msk [vmem:[#allocation2 + $0x38] sm:$0xff] %vm305_vm2, %v721_v15  ;;  %v719_v27 = vadd.f32 %v606_v17, %v379_v11  ;;  %v384_v13 = vld [vmem:[#allocation2 + $0x50] sm:$0xff] }
  0xe9   : > { %v910_v20 = vmax.f32 %v878_v8, 0.0  ;;  %v876_v22 = vadd.f32 %v1602_v57, %v837_v10  ;;  %v840_v24 = vmul.f32 %v1595_v49, %v801_v14  ;;  %v783_v25 = vld [vmem:[#allocation2 + $0x8] sm:$0xff]  ;;  %770 = vst.msk [vmem:[#allocation2 + $0xb8] sm:$0xff] %vm305_vm2, %v737_v16  ;;  %v735_v28 = vadd.f32 %v670_v18, %v395_v12  ;;  %v1627_v29 = vpop.f32.mrf.mxu0  ;;  %v1629_v30 = vpop.f32.mrf.mxu1  ;;  %v400_v14 = vld [vmem:[#allocation2 + $0xd0] sm:$0xff] }
  0xea   : > { %v799_v26 = vld [vmem:[#allocation2 + $0x88] sm:$0xff]  ;;  %v1292_v31 = vpack.c.bf16 %v894_v19, %v894_v19  ;;  %v892_v33 = vmax.f32 %v860_v21, 0.0  ;;  %v863_v35 = vadd.f32 %v1602_v57, %v824_v23  ;;  %v822_v37 = vmul.f32 %v1595_v49, %v783_v25  ;;  %752 = vst.msk [vmem:[#allocation2 + $0x28] sm:$0xff] %vm305_vm2, %v719_v27  ;;  %v382_v23 = vld [vmem:[#allocation2 + $0x40] sm:$0xff] }
  0xeb   : > { %v1308_v32 = vpack.c.bf16 %v910_v20, %v910_v20  ;;  %v908_v34 = vmax.f32 %v876_v22, 0.0  ;;  %v879_v36 = vadd.f32 %v1602_v57, %v840_v24  ;;  %v838_v38 = vmul.f32 %v1595_v49, %v799_v26  ;;  %v788_v39 = vld [vmem:[#allocation2 + $0x30] sm:$0xff]  ;;  %768 = vst.msk [vmem:[#allocation2 + $0xa8] sm:$0xff] %vm305_vm2, %v735_v28  ;;  %v1637_v41 = vpop.f32.mrf.mxu0  ;;  %v1639_v42 = vpop.f32.mrf.mxu1  ;;  %v398_v28 = vld [vmem:[#allocation2 + $0xc0] sm:$0xff] }
  0xec   : > { %v804_v40 = vld [vmem:[#allocation2 + $0xb0] sm:$0xff]  ;;  %1055 = vst.msk [vmem:[%s1621_s9 + $0x8] sm:$0xf] %vm1052_vm4, %v1292_v31  ;;  %v1290_v43 = vpack.c.bf16 %v892_v33, %v892_v33  ;;  %v827_v45 = vmul.f32 %v1595_v49, %v788_v39  ;;  %v895_v47 = vmax.f32 %v863_v35, 0.0  ;;  %v861_v50 = vadd.f32 %v1602_v57, %v822_v37  ;;  %v385_v31 = vld [vmem:[#allocation2 + $0x58] sm:$0xff]  ;;  %v383_v39 = vld [vmem:[#allocation2 + $0x48] sm:$0xff] }
  0xed   : > { %1071 = vst.msk [vmem:[%s1621_s9 + $0x48] sm:$0xf] %vm1052_vm4, %v1308_v32  ;;  %v1306_v44 = vpack.c.bf16 %v908_v34, %v908_v34  ;;  %v843_v46 = vmul.f32 %v1595_v49, %v804_v40  ;;  %v911_v48 = vmax.f32 %v879_v36, 0.0  ;;  %v877_v51 = vadd.f32 %v1602_v57, %v838_v38  ;;  %v786_v52 = vld [vmem:[#allocation2 + $0x20] sm:$0xff]  ;;  %v1649_v54 = vpop.f32.mrf.mxu0  ;;  %v1651_v55 = vpop.f32.mrf.mxu1  ;;  %v401_v32 = vld [vmem:[#allocation2 + $0xd8] sm:$0xff] }
  0xee   : > { %v802_v53 = vld [vmem:[#allocation2 + $0xa0] sm:$0xff]  ;;  %1053 = vst.msk [vmem:[%s1621_s9] sm:$0xf] %vm1052_vm4, %v1290_v43  ;;  %v866_v56 = vadd.f32 %v1602_v57, %v827_v45  ;;  %v825_v59 = vmul.f32 %v1595_v49, %v786_v52  ;;  %v1293_v61 = vpack.c.bf16 %v895_v47, %v895_v47  ;;  %v893_v63 = vmax.f32 %v861_v50, 0.0  ;;  %v388_v47 = vld [vmem:[#allocation2 + $0x70] sm:$0xff] }
  0xef   : > { %1069 = vst.msk [vmem:[%s1621_s9 + $0x40] sm:$0xf] %vm1052_vm4, %v1306_v44  ;;  %v882_v58 = vadd.f32 %v1602_v57, %v843_v46  ;;  %v841_v60 = vmul.f32 %v1595_v49, %v802_v53  ;;  %v1309_v62 = vpack.c.bf16 %v911_v48, %v911_v48  ;;  %v909_v0 = vmax.f32 %v877_v51, 0.0  ;;  %v1661_v1 = vpop.f32.mrf.mxu0  ;;  %v1663_v2 = vpop.f32.mrf.mxu1  ;;  %v789_v7 = vld [vmem:[#allocation2 + $0x38] sm:$0xff]  ;;  %v399_v46 = vld [vmem:[#allocation2 + $0xc8] sm:$0xff]  ;;  %v404_v48 = vld [vmem:[#allocation2 + $0xf0] sm:$0xff] }
  0xf0   : > { %v898_v3 = vmax.f32 %v866_v56, 0.0  ;;  %v864_v5 = vadd.f32 %v1602_v57, %v825_v59  ;;  %v805_v8 = vld [vmem:[#allocation2 + $0xb8] sm:$0xff]  ;;  %1056 = vst.msk [vmem:[%s1621_s9 + $0xc] sm:$0xf] %vm1052_vm4, %v1293_v61  ;;  %v1291_v9 = vpack.c.bf16 %v893_v63, %v893_v63  ;;  %v828_v11 = vmul.f32 %v1595_v49, %v789_v7  ;;  %v386_v56 = vld [vmem:[#allocation2 + $0x60] sm:$0xff] }
  0xf1   : > { %v914_v4 = vmax.f32 %v882_v58, 0.0  ;;  %v880_v6 = vadd.f32 %v1602_v57, %v841_v60  ;;  %1072 = vst.msk [vmem:[%s1621_s9 + $0x4c] sm:$0xf] %vm1052_vm4, %v1309_v62  ;;  %v1307_v10 = vpack.c.bf16 %v909_v0, %v909_v0  ;;  %v844_v12 = vmul.f32 %v1595_v49, %v805_v8  ;;  %v1358_v15 = vpop.f32.mrf.mxu0  ;;  %v1374_v16 = vpop.f32.mrf.mxu1  ;;  %v787_v21 = vld [vmem:[#allocation2 + $0x28] sm:$0xff]  ;;  %v402_v58 = vld [vmem:[#allocation2 + $0xe0] sm:$0xff]  ;;  %v389_v59 = vld [vmem:[#allocation2 + $0x78] sm:$0xff] }
  0xf2   : > { %v1296_v17 = vpack.c.bf16 %v898_v3, %v898_v3  ;;  %v896_v19 = vmax.f32 %v864_v5, 0.0  ;;  %v803_v22 = vld [vmem:[#allocation2 + $0xa8] sm:$0xff]  ;;  %1054 = vst.msk [vmem:[%s1621_s9 + $0x4] sm:$0xf] %vm1052_vm4, %v1291_v9  ;;  %v867_v24 = vadd.f32 %v1602_v57, %v828_v11  ;;  %v826_v26 = vmul.f32 %v1595_v49, %v787_v21  ;;  %v405_v0 = vld [vmem:[#allocation2 + $0xf8] sm:$0xff] }
  0xf3   : > { %v1312_v18 = vpack.c.bf16 %v914_v4, %v914_v4  ;;  %v912_v20 = vmax.f32 %v880_v6, 0.0  ;;  %1070 = vst.msk [vmem:[%s1621_s9 + $0x44] sm:$0xf] %vm1052_vm4, %v1307_v10  ;;  %v883_v25 = vadd.f32 %v1602_v57, %v844_v12  ;;  %v842_v27 = vmul.f32 %v1595_v49, %v803_v22  ;;  %v635_v33 = vpop.f32.mrf.mxu0  ;;  %v699_v34 = vpop.f32.mrf.mxu1  ;;  %v387_v3 = vld [vmem:[#allocation2 + $0x68] sm:$0xff] }
  0xf4   : > { %1059 = vst.msk [vmem:[%s1621_s9 + $0x18] sm:$0xf] %vm1052_vm4, %v1296_v17  ;;  %v1294_v35 = vpack.c.bf16 %v896_v19, %v896_v19  ;;  %v724_v37 = vadd.f32 %v1627_v29, %v384_v13  ;;  %v740_v38 = vadd.f32 %v1629_v30, %v400_v14  ;;  %v899_v40 = vmax.f32 %v867_v24, 0.0  ;;  %v403_v5 = vld [vmem:[#allocation2 + $0xe8] sm:$0xff] }
  0xf5   : > { %1075 = vst.msk [vmem:[%s1621_s9 + $0x58] sm:$0xf] %vm1052_vm4, %v1312_v18  ;;  %v1310_v36 = vpack.c.bf16 %v912_v20, %v912_v20  ;;  %v915_v43 = vmax.f32 %v883_v25, 0.0  ;;  %v865_v44 = vadd.f32 %v1602_v57, %v826_v26  ;;  %v881_v45 = vadd.f32 %v1602_v57, %v842_v27  ;;  %v1359_v50 = vpop.f32.mrf.mxu0  ;;  %v1375_v51 = vpop.f32.mrf.mxu1 }
  0xf6   : > { %1057 = vst.msk [vmem:[%s1621_s9 + $0x10] sm:$0xf] %vm1052_vm4, %v1294_v35  ;;  %v722_v29 = vadd.f32 %v1637_v41, %v382_v23  ;;  %v738_v30 = vadd.f32 %v1639_v42, %v398_v28  ;;  %v725_v52 = vadd.f32 %v1649_v54, %v385_v31  ;;  %v741_v53 = vadd.f32 %v1651_v55, %v401_v32 }
  0xf7   : > { %1073 = vst.msk [vmem:[%s1621_s9 + $0x50] sm:$0xf] %vm1052_vm4, %v1310_v36  ;;  %v1297_v60 = vpack.c.bf16 %v899_v40, %v899_v40  ;;  %v1313_v61 = vpack.c.bf16 %v915_v43, %v915_v43  ;;  %v897_v62 = vmax.f32 %v865_v44, 0.0  ;;  %v913_v63 = vmax.f32 %v881_v45, 0.0  ;;  %v638_v4 = vpop.f32.mrf.mxu0  ;;  %v702_v41 = vpop.f32.mrf.mxu1 }
  0xf8   : > { %757 = vst.msk [vmem:[#allocation2 + $0x50] sm:$0xff] %vm305_vm2, %v724_v37  ;;  %773 = vst.msk [vmem:[#allocation2 + $0xd0] sm:$0xff] %vm305_vm2, %v740_v38  ;;  %v723_v42 = vadd.f32 %v1661_v1, %v383_v39  ;;  %v739_v54 = vadd.f32 %v1663_v2, %v399_v46  ;;  %v728_v55 = vadd.f32 %v1358_v15, %v388_v47 }
  0xf9   : > { %755 = vst.msk [vmem:[#allocation2 + $0x40] sm:$0xff] %vm305_vm2, %v722_v29  ;;  %771 = vst.msk [vmem:[#allocation2 + $0xc0] sm:$0xff] %vm305_vm2, %v738_v30  ;;  %v744_v6 = vadd.f32 %v1374_v16, %v404_v48  ;;  %v1295_v7 = vpack.c.bf16 %v897_v62, %v897_v62  ;;  %v1311_v8 = vpack.c.bf16 %v913_v63, %v913_v63 }
  0xfa   : > { %758 = vst.msk [vmem:[#allocation2 + $0x58] sm:$0xff] %vm305_vm2, %v725_v52  ;;  %774 = vst.msk [vmem:[#allocation2 + $0xd8] sm:$0xff] %vm305_vm2, %v741_v53  ;;  %v726_v9 = vadd.f32 %v635_v33, %v386_v56  ;;  %v742_v10 = vadd.f32 %v699_v34, %v402_v58  ;;  %v729_v1 = vadd.f32 %v1359_v50, %v389_v59 }
  0xfb   : > { %1060 = vst.msk [vmem:[%s1621_s9 + $0x1c] sm:$0xf] %vm1052_vm4, %v1297_v60  ;;  %1076 = vst.msk [vmem:[%s1621_s9 + $0x5c] sm:$0xf] %vm1052_vm4, %v1313_v61  ;;  %v745_v2 = vadd.f32 %v1375_v51, %v405_v0  ;;  %v727_v11 = vadd.f32 %v638_v4, %v387_v3  ;;  %v743_v12 = vadd.f32 %v702_v41, %v403_v5 }
  0xfc   : > { %756 = vst.msk [vmem:[#allocation2 + $0x48] sm:$0xff] %vm305_vm2, %v723_v42  ;;  %772 = vst.msk [vmem:[#allocation2 + $0xc8] sm:$0xff] %vm305_vm2, %v739_v54 }
  0xfd   : > { %761 = vst.msk [vmem:[#allocation2 + $0x70] sm:$0xff] %vm305_vm2, %v728_v55  ;;  %777 = vst.msk [vmem:[#allocation2 + $0xf0] sm:$0xff] %vm305_vm2, %v744_v6 }
  0xfe   : > { %1058 = vst.msk [vmem:[%s1621_s9 + $0x14] sm:$0xf] %vm1052_vm4, %v1295_v7  ;;  %1074 = vst.msk [vmem:[%s1621_s9 + $0x54] sm:$0xf] %vm1052_vm4, %v1311_v8 }
  0xff   : > { %759 = vst.msk [vmem:[#allocation2 + $0x60] sm:$0xff] %vm305_vm2, %v726_v9  ;;  %775 = vst.msk [vmem:[#allocation2 + $0xe0] sm:$0xff] %vm305_vm2, %v742_v10  ;;  %v792_v13 = vld [vmem:[#allocation2 + $0x50] sm:$0xff] }
 0x100   : > { %762 = vst.msk [vmem:[#allocation2 + $0x78] sm:$0xff] %vm305_vm2, %v729_v1  ;;  %778 = vst.msk [vmem:[#allocation2 + $0xf8] sm:$0xff] %vm305_vm2, %v745_v2  ;;  %v808_v14 = vld [vmem:[#allocation2 + $0xd0] sm:$0xff]  ;;  %v831_v15 = vmul.f32 %v1595_v49, %v792_v13  ;;  %v790_v17 = vld [vmem:[#allocation2 + $0x40] sm:$0xff] }
 0x101   : > { %760 = vst.msk [vmem:[#allocation2 + $0x68] sm:$0xff] %vm305_vm2, %v727_v11  ;;  %776 = vst.msk [vmem:[#allocation2 + $0xe8] sm:$0xff] %vm305_vm2, %v743_v12  ;;  %v847_v16 = vmul.f32 %v1595_v49, %v808_v14  ;;  %v806_v18 = vld [vmem:[#allocation2 + $0xc0] sm:$0xff]  ;;  %v793_v19 = vld [vmem:[#allocation2 + $0x58] sm:$0xff]  ;;  %v829_v22 = vmul.f32 %v1595_v49, %v790_v17 }
 0x102   : > { %v870_v20 = vadd.f32 %v1602_v57, %v831_v15  ;;  %v845_v23 = vmul.f32 %v1595_v49, %v806_v18  ;;  %v809_v24 = vld [vmem:[#allocation2 + $0xd8] sm:$0xff]  ;;  %v832_v25 = vmul.f32 %v1595_v49, %v793_v19 }
 0x103   : > { %v886_v21 = vadd.f32 %v1602_v57, %v847_v16  ;;  %v848_v26 = vmul.f32 %v1595_v49, %v809_v24  ;;  %v791_v27 = vld [vmem:[#allocation2 + $0x48] sm:$0xff]  ;;  %v868_v33 = vadd.f32 %v1602_v57, %v829_v22 }
 0x104   : > { %v807_v28 = vld [vmem:[#allocation2 + $0xc8] sm:$0xff]  ;;  %v902_v31 = vmax.f32 %v870_v20, 0.0  ;;  %v884_v34 = vadd.f32 %v1602_v57, %v845_v23  ;;  %v871_v35 = vadd.f32 %v1602_v57, %v832_v25  ;;  %v830_v37 = vmul.f32 %v1595_v49, %v791_v27  ;;  %v796_v39 = vld [vmem:[#allocation2 + $0x70] sm:$0xff] }
 0x105   : > { %v918_v32 = vmax.f32 %v886_v21, 0.0  ;;  %v887_v36 = vadd.f32 %v1602_v57, %v848_v26  ;;  %v846_v38 = vmul.f32 %v1595_v49, %v807_v28  ;;  %v812_v40 = vld [vmem:[#allocation2 + $0xf0] sm:$0xff]  ;;  %v900_v45 = vmax.f32 %v868_v33, 0.0 }
 0x106   : > { %v1300_v43 = vpack.c.bf16 %v902_v31, %v902_v31  ;;  %v916_v46 = vmax.f32 %v884_v34, 0.0  ;;  %v903_v47 = vmax.f32 %v871_v35, 0.0  ;;  %v869_v50 = vadd.f32 %v1602_v57, %v830_v37  ;;  %v794_v29 = vld [vmem:[#allocation2 + $0x60] sm:$0xff] }
 0x107   : > { %v1316_v44 = vpack.c.bf16 %v918_v32, %v918_v32  ;;  %v919_v48 = vmax.f32 %v887_v36, 0.0  ;;  %v885_v51 = vadd.f32 %v1602_v57, %v846_v38  ;;  %v810_v30 = vld [vmem:[#allocation2 + $0xe0] sm:$0xff]  ;;  %v1298_v52 = vpack.c.bf16 %v900_v45, %v900_v45  ;;  %v797_v59 = vld [vmem:[#allocation2 + $0x78] sm:$0xff] }
 0x108   : > { %1063 = vst.msk [vmem:[%s1621_s9 + $0x28] sm:$0xf] %vm1052_vm4, %v1300_v43  ;;  %v1314_v53 = vpack.c.bf16 %v916_v46, %v916_v46  ;;  %v835_v56 = vmul.f32 %v1595_v49, %v796_v39  ;;  %v851_v58 = vmul.f32 %v1595_v49, %v812_v40  ;;  %v813_v60 = vld [vmem:[#allocation2 + $0xf8] sm:$0xff]  ;;  %v1301_v61 = vpack.c.bf16 %v903_v47, %v903_v47  ;;  %v795_v42 = vld [vmem:[#allocation2 + $0x68] sm:$0xff] }
 0x109   : > { %1079 = vst.msk [vmem:[%s1621_s9 + $0x68] sm:$0xf] %vm1052_vm4, %v1316_v44  ;;  %v1317_v62 = vpack.c.bf16 %v919_v48, %v919_v48  ;;  %v901_v63 = vmax.f32 %v869_v50, 0.0  ;;  %v917_v0 = vmax.f32 %v885_v51, 0.0  ;;  %1061 = vst.msk [vmem:[%s1621_s9 + $0x20] sm:$0xf] %vm1052_vm4, %v1298_v52  ;;  %v833_v5 = vmul.f32 %v1595_v49, %v794_v29 }
 0x10a   : > { %1077 = vst.msk [vmem:[%s1621_s9 + $0x60] sm:$0xf] %vm1052_vm4, %v1314_v53  ;;  %v874_v3 = vadd.f32 %v1602_v57, %v835_v56  ;;  %v890_v4 = vadd.f32 %v1602_v57, %v851_v58  ;;  %v849_v41 = vmul.f32 %v1595_v49, %v810_v30  ;;  %v811_v54 = vld [vmem:[#allocation2 + $0xe8] sm:$0xff]  ;;  %1064 = vst.msk [vmem:[%s1621_s9 + $0x2c] sm:$0xf] %vm1052_vm4, %v1301_v61 }
 0x10b   : > { %1080 = vst.msk [vmem:[%s1621_s9 + $0x6c] sm:$0xf] %vm1052_vm4, %v1317_v62  ;;  %v1299_v55 = vpack.c.bf16 %v901_v63, %v901_v63  ;;  %v1315_v6 = vpack.c.bf16 %v917_v0, %v917_v0  ;;  %v836_v7 = vmul.f32 %v1595_v49, %v797_v59  ;;  %v852_v8 = vmul.f32 %v1595_v49, %v813_v60 }
 0x10c   : > { %v906_v9 = vmax.f32 %v874_v3, 0.0  ;;  %v922_v10 = vmax.f32 %v890_v4, 0.0  ;;  %v872_v1 = vadd.f32 %v1602_v57, %v833_v5  ;;  %v888_v2 = vadd.f32 %v1602_v57, %v849_v41 }
 0x10d   : > { %1062 = vst.msk [vmem:[%s1621_s9 + $0x24] sm:$0xf] %vm1052_vm4, %v1299_v55  ;;  %1078 = vst.msk [vmem:[%s1621_s9 + $0x64] sm:$0xf] %vm1052_vm4, %v1315_v6  ;;  %v875_v11 = vadd.f32 %v1602_v57, %v836_v7  ;;  %v891_v12 = vadd.f32 %v1602_v57, %v852_v8  ;;  %v834_v13 = vmul.f32 %v1595_v49, %v795_v42 }
 0x10e   : > { %v850_v14 = vmul.f32 %v1595_v49, %v811_v54  ;;  %v1304_v15 = vpack.c.bf16 %v906_v9, %v906_v9  ;;  %v1320_v16 = vpack.c.bf16 %v922_v10, %v922_v10  ;;  %v904_v17 = vmax.f32 %v872_v1, 0.0 }
 0x10f   : > { %v920_v18 = vmax.f32 %v888_v2, 0.0  ;;  %v907_v19 = vmax.f32 %v875_v11, 0.0  ;;  %v923_v20 = vmax.f32 %v891_v12, 0.0  ;;  %v873_v21 = vadd.f32 %v1602_v57, %v834_v13 }
 0x110   : > { %v889_v22 = vadd.f32 %v1602_v57, %v850_v14  ;;  %1067 = vst.msk [vmem:[%s1621_s9 + $0x38] sm:$0xf] %vm1052_vm4, %v1304_v15  ;;  %1083 = vst.msk [vmem:[%s1621_s9 + $0x78] sm:$0xf] %vm1052_vm4, %v1320_v16  ;;  %v1302_v49 = vpack.c.bf16 %v904_v17, %v904_v17 }
 0x111   : > { %v1318_v23 = vpack.c.bf16 %v920_v18, %v920_v18  ;;  %v1305_v24 = vpack.c.bf16 %v907_v19, %v907_v19  ;;  %v1321_v25 = vpack.c.bf16 %v923_v20, %v923_v20  ;;  %v905_v26 = vmax.f32 %v873_v21, 0.0 }
 0x112   : > { %v921_v27 = vmax.f32 %v889_v22, 0.0  ;;  %1065 = vst.msk [vmem:[%s1621_s9 + $0x30] sm:$0xf] %vm1052_vm4, %v1302_v49 }
 0x113   : > { %1081 = vst.msk [vmem:[%s1621_s9 + $0x70] sm:$0xf] %vm1052_vm4, %v1318_v23  ;;  %1068 = vst.msk [vmem:[%s1621_s9 + $0x3c] sm:$0xf] %vm1052_vm4, %v1305_v24  ;;  %v1303_v57 = vpack.c.bf16 %v905_v26, %v905_v26 }
 0x114   : > { %1084 = vst.msk [vmem:[%s1621_s9 + $0x7c] sm:$0xf] %vm1052_vm4, %v1321_v25  ;;  %v1319_v28 = vpack.c.bf16 %v921_v27, %v921_v27 }
 0x115   : > { %1066 = vst.msk [vmem:[%s1621_s9 + $0x34] sm:$0xf] %vm1052_vm4, %v1303_v57 }
 0x116   : > { %1082 = vst.msk [vmem:[%s1621_s9 + $0x74] sm:$0xf] %vm1052_vm4, %v1319_v28 }
 0x117 PF: > { %s14_s17 = sadd.s32 1, %s1446_s17   ;;  %s1802_s15 = smov %s1442_s16 }
 0x118   : > { %p11_p5 = scmp.ge.s32.totalorder %s14_s17, 4   ;;  %s1803_s16 = smov %s1805_s18 }
 0x11a   :  { %13 = sbr.rel (!%p11_p5) target bundleno = 2 (0x2), region = 83 }

</bundles_post_ra>
